<compile_context>
chip_gen: v5e
topology: v5e:2x2
jax: 0.10.0
libtpu: 0.0.40
codegen_flags: <defaults>
</compile_context>

<pallas_src>
import functools

import jax
import jax.numpy as jnp
from jax.experimental import pallas as pl
from jax.experimental.pallas import tpu as pltpu


def _round_up(x, m):
    return (x + m - 1) // m * m


def _make_kernel(use_classifier: bool, TB: int, HWp: int, Cf_p: int, inv_hw: float):
    if use_classifier:
        def kernel(x_ref, wf_ref, wc_ref, out_ref):
            # features(x): 1x1 conv == single bf16 MXU matmul (bias folded in wf).
            feat = jnp.dot(x_ref[...], wf_ref[...],
                           preferred_element_type=jnp.float32)      # (TB*HWp, Cf_p)
            feat = jnp.maximum(feat, 0.0)                            # ReLU
            # avg_pool over the 49 valid spatial rows: free reshape (splits the
            # sublane dim on a multiple-of-8 boundary) + sublane sum, f32 scale.
            pooled = jnp.sum(feat.reshape(TB, HWp, Cf_p), axis=1) * inv_hw
            # classifier: bf16 MXU matmul, f32 accumulation.  Column C_feat of
            # `pooled` is exactly 1.0 (bias-row trick in wf), and row C_feat of
            # wc carries bc -> bias folded, no broadcast add.
            out = jnp.dot(pooled.astype(jnp.bfloat16), wc_ref[...],
                          preferred_element_type=jnp.float32)        # (TB, Nout_p)
            out_ref[...] = out.astype(out_ref.dtype)
    else:
        def kernel(x_ref, wf_ref, out_ref):
            feat = jnp.dot(x_ref[...], wf_ref[...],
                           preferred_element_type=jnp.float32)
            feat = jnp.maximum(feat, 0.0)
            pooled = jnp.sum(feat.reshape(TB, HWp, Cf_p), axis=1) * inv_hw
            out_ref[...] = pooled.astype(out_ref.dtype)
    return kernel


def visual_model_forward(x_nchw, wf, bf, wc=None, bc=None, *,
                         use_classifier, batch_tile=128):
    """x_nchw: (B, C_in, H, W) f32.  Returns (B, num_out) or (B, C_feat) f32."""
    B, C, H, W = x_nchw.shape
    HW = H * W
    HWp = _round_up(HW, 8)                      # 49 -> 56 (sublane aligned)

    # Batch tile: cap at `batch_tile` (VMEM budget), but aim for >=2 grid steps
    # when the batch is large enough so both v7x TensorCores get work.
    TB = min(batch_tile, max(8, _round_up(-(-B // 2), 8)))
    Bp = _round_up(B, TB)
    n_blocks = Bp // TB

    C_feat = wf.shape[1]
    # One spare padded column is reserved (classifier path) to carry the 1.0
    # that folds bc into wc; don't widen beyond the next 128 multiple.
    Cf_p = _round_up(C_feat + (1 if use_classifier else 0), 128)

    # ---- wrapper-side packing (fused by XLA into a single copy) ----
    # Cast to bf16 FIRST so the packing transpose/pad moves half the bytes.
    # TODO(synk): with the real backbone restored, fold this layout change into
    # the producing conv's output layout instead of a standalone transpose op.
    xb = x_nchw.astype(jnp.bfloat16)
    x3 = jnp.transpose(xb, (0, 2, 3, 1)).reshape(B, HW, C)          # NCHW->(B,HW,C)
    x3 = jnp.concatenate([x3, jnp.ones((B, HW, 1), jnp.bfloat16)], axis=-1)
    x3 = jnp.pad(x3, ((0, Bp - B), (0, HWp - HW), (0, 0)))
    x2d = x3.reshape(Bp * HWp, C + 1)                               # bf16

    # Feature weights: bf folded as the last row; if classifier, column C_feat
    # gets a 1.0 in the bias row so pooled[:, C_feat] == 1.0 exactly.
    wf_aug = jnp.concatenate([wf, bf.reshape(1, C_feat)], axis=0)   # (C+1, Cf)
    wf_p = jnp.zeros((C + 1, Cf_p), jnp.float32).at[:, :C_feat].set(wf_aug)
    if use_classifier:
        wf_p = wf_p.at[C, C_feat].set(1.0)
    wf_p = wf_p.astype(jnp.bfloat16)

    x_spec = pl.BlockSpec((TB * HWp, C + 1), lambda i: (i, 0))
    wf_spec = pl.BlockSpec(wf_p.shape, lambda i: (0, 0))

    if use_classifier:
        num_out = wc.shape[1]
        Nout_p = _round_up(num_out, 128)
        # Classifier weights in bf16 (MXU-native); bc folded as row C_feat.
        wc_p = jnp.zeros((Cf_p, Nout_p), jnp.float32)
        wc_p = wc_p.at[:C_feat, :num_out].set(wc)
        wc_p = wc_p.at[C_feat, :num_out].set(bc.reshape(num_out))
        wc_p = wc_p.astype(jnp.bfloat16)
        inputs = (x2d, wf_p, wc_p)
        in_specs = [x_spec, wf_spec, pl.BlockSpec(wc_p.shape, lambda i: (0, 0))]
    else:
        num_out = C_feat
        Nout_p = Cf_p
        inputs = (x2d, wf_p)
        in_specs = [x_spec, wf_spec]

    flops = 2 * Bp * HWp * (C + 1) * Cf_p
    if use_classifier:
        flops += 2 * Bp * Cf_p * Nout_p
    bytes_accessed = (sum(int(a.size) * a.dtype.itemsize for a in inputs)
                      + Bp * Nout_p * 4)

    out_full = pl.pallas_call(
        _make_kernel(use_classifier, TB, HWp, Cf_p, 1.0 / HW),
        out_shape=jax.ShapeDtypeStruct((Bp, Nout_p), jnp.float32),
        grid_spec=pl.GridSpec(
            grid=(n_blocks,),
            in_specs=in_specs,
            out_specs=pl.BlockSpec((TB, Nout_p), lambda i: (i, 0)),
        ),
        compiler_params=pltpu.CompilerParams(
            dimension_semantics=("parallel",)),
        cost_estimate=pl.CostEstimate(flops=int(flops), transcendentals=0,
                                      bytes_accessed=int(bytes_accessed)),
    )(*inputs)

    return out_full[:B, :num_out]


def _reference(x_nchw, wf, bf, wc, bc, *, use_classifier):
    B, C, H, W = x_nchw.shape
    x = jnp.transpose(x_nchw, (0, 2, 3, 1)).reshape(B, H * W, C)
    feat = jnp.maximum(jnp.einsum("bhc,cf->bhf", x, wf) + bf[None], 0.0)
    pooled = jnp.mean(feat, axis=1)
    if use_classifier:
        return pooled @ wc + bc
    return pooled


if __name__ == "__main__":
    # Shapes consistent with the module: avg_pool2d(k=7) on a 7x7 feature map.
    B, C_in, H, W = 2, 4, 7, 7
    C_feat = 32          # backbone classifier.in_features
    num_out = 16         # args.num_objects

    key = jax.random.PRNGKey(0)
    kx, kwf, kbf, kwc, kbc = jax.random.split(key, 5)
    x = jax.random.normal(kx, (B, C_in, H, W), dtype=jnp.float32)
    wf = jax.random.normal(kwf, (C_in, C_feat), dtype=jnp.float32) * 0.1
    bf = jax.random.normal(kbf, (1, C_feat), dtype=jnp.float32) * 0.1
    wc = jax.random.normal(kwc, (C_feat, num_out), dtype=jnp.float32) * 0.1
    bc = jax.random.normal(kbc, (1, num_out), dtype=jnp.float32) * 0.1

    # Path 1: num_features != num_out -> use_classifier=True (module's case here)
    fwd = jax.jit(functools.partial(visual_model_forward, use_classifier=True))
    out = jax.block_until_ready(fwd(x, wf, bf, wc, bc))
    ref = _reference(x, wf, bf, wc, bc, use_classifier=True)
    assert out.shape == (B, num_out), out.shape
    # bf16 matmuls with f32 accumulation -> loosened tolerance vs f32 ref
    assert jnp.allclose(out, ref, atol=2e-2, rtol=2e-2), "classifier path mismatch"

    # Path 2: num_features == num_out -> use_classifier=False (features+relu+pool)
    fwd2 = jax.jit(functools.partial(visual_model_forward, use_classifier=False))
    out2 = jax.block_until_ready(fwd2(x, wf, bf))
    ref2 = _reference(x, wf, bf, wc, bc, use_classifier=False)
    assert out2.shape == (B, C_feat), out2.shape
    assert jnp.allclose(out2, ref2, atol=2e-2, rtol=2e-2), "feature path mismatch"

    print("KERNEL_OK")
</pallas_src>

<mosaic_0001>
module attributes {stable_mosaic.version = 11 : i64} {
  func.func @kernel(%arg0: i32, %arg1: memref<448x5xbf16, #tpu.memory_space<vmem>>, %arg2: memref<5x128xbf16, #tpu.memory_space<vmem>>, %arg3: memref<128x128xbf16, #tpu.memory_space<vmem>>, %arg4: memref<8x128xf32, #tpu.memory_space<vmem>>) attributes {dimension_semantics = [#tpu.dimension_semantics<parallel>], iteration_bounds = array<i64: 1>, scalar_prefetch = 0 : i64, scratch_operands = 0 : i64, tpu.core_type = #tpu.core_type<tc>, window_params = [{transform_indices = @transform_0, window_bounds = array<i64: 448, 5>}, {pipeline_mode = #tpu.pipeline_mode<synchronous>, transform_indices = @transform_1, window_bounds = array<i64: 5, 128>}, {pipeline_mode = #tpu.pipeline_mode<synchronous>, transform_indices = @transform_2, window_bounds = array<i64: 128, 128>}, {transform_indices = @transform_3, window_bounds = array<i64: 8, 128>}]} {
    %c0 = arith.constant 0 : index
    %c0_0 = arith.constant 0 : index
    %0 = vector.load %arg1[%c0, %c0_0] : memref<448x5xbf16, #tpu.memory_space<vmem>>, vector<448x5xbf16>
    %c0_1 = arith.constant 0 : index
    %c0_2 = arith.constant 0 : index
    %1 = vector.load %arg2[%c0_1, %c0_2] : memref<5x128xbf16, #tpu.memory_space<vmem>>, vector<5x128xbf16>
    %cst = arith.constant dense<0.000000e+00> : vector<448x128xf32>
    %2 = tpu.matmul %0, %1, %cst {dimension_numbers = #tpu.dot_dimension_numbers<[1], [0], [0], [1], [0, 0, 1, 1], [], []>} : vector<448x5xbf16>, vector<5x128xbf16>, vector<448x128xf32> -> vector<448x128xf32>
    %cst_3 = arith.constant 0.000000e+00 : f32
    %3 = vector.broadcast %cst_3 : f32 to vector<448x128xf32>
    %4 = arith.maximumf %2, %3 : vector<448x128xf32>
    %5 = vector.shape_cast %4 : vector<448x128xf32> to vector<8x56x128xf32>
    %cst_4 = arith.constant dense<0.000000e+00> : vector<8x128xf32>
    %6 = vector.multi_reduction <add>, %5, %cst_4 [1] : vector<8x56x128xf32> to vector<8x128xf32>
    %cst_5 = arith.constant 0.0204081628 : f32
    %7 = vector.broadcast %cst_5 : f32 to vector<8x128xf32>
    %8 = arith.mulf %6, %7 : vector<8x128xf32>
    %9 = arith.truncf %8 : vector<8x128xf32> to vector<8x128xbf16>
    %c0_6 = arith.constant 0 : index
    %c0_7 = arith.constant 0 : index
    %10 = vector.load %arg3[%c0_6, %c0_7] : memref<128x128xbf16, #tpu.memory_space<vmem>>, vector<128x128xbf16>
    %cst_8 = arith.constant dense<0.000000e+00> : vector<8x128xf32>
    %11 = tpu.matmul %9, %10, %cst_8 {dimension_numbers = #tpu.dot_dimension_numbers<[1], [0], [0], [1], [0, 0, 1, 1], [], []>} : vector<8x128xbf16>, vector<128x128xbf16>, vector<8x128xf32> -> vector<8x128xf32>
    %c0_9 = arith.constant 0 : index
    %c0_10 = arith.constant 0 : index
    %12 = vector.load %arg4[%c0_9, %c0_10] : memref<8x128xf32, #tpu.memory_space<vmem>>, vector<8x128xf32>
    tpu.vector_store %arg4[%c0_9, %c0_10], %11 {strides = array<i32>} : memref<8x128xf32, #tpu.memory_space<vmem>>, vector<8x128xf32>,
    return
  }
  func.func @transform_0(%arg0: i32) -> (i32, i32) {
    %c0_i32 = arith.constant 0 : i32
    %c0_i32_0 = arith.constant 0 : i32
    return %arg0, %c0_i32 : i32, i32
  }
  func.func @transform_1(%arg0: i32) -> (i32, i32) {
    %c0_i32 = arith.constant 0 : i32
    %c0_i32_0 = arith.constant 0 : i32
    %c0_i32_1 = arith.constant 0 : i32
    return %c0_i32, %c0_i32_0 : i32, i32
  }
  func.func @transform_2(%arg0: i32) -> (i32, i32) {
    %c0_i32 = arith.constant 0 : i32
    %c0_i32_0 = arith.constant 0 : i32
    %c0_i32_1 = arith.constant 0 : i32
    return %c0_i32, %c0_i32_0 : i32, i32
  }
  func.func @transform_3(%arg0: i32) -> (i32, i32) {
    %c0_i32 = arith.constant 0 : i32
    %c0_i32_0 = arith.constant 0 : i32
    return %arg0, %c0_i32 : i32, i32
  }
}

</mosaic_0001>

<bundles_post_ra>
// kernel: visual_model_forward.1
= control target key start
LH: loop header
LB: loop body
LE: loop exit
PB: predicated region body
PF: predicated region fallthrough
CT: control target
= control target key end

     0   :  { %vm297_vm0 = vcmask 1041408   ;;  %vm298_vm1 = vcmask 1042432   ;;  %v947_v1 = vmov 65535   ;;  %vm212_vm2 = vcmask 39936   ;;  %s1151_s1 = inlined_call_operand.vmem [shape: bf16[5,128], index: 1, kind: input, shape index: {}]   ;;  %s1152_s0 = inlined_call_operand.vmem [shape: bf16[448,5], index: 0, kind: input, shape index: {}]   ;;  %s1153_s2 = inlined_call_operand.vmem [shape: bf16[128,128], index: 2, kind: input, shape index: {}]   ;;  %s1154_s3 = inlined_call_operand.vmem [shape: f32[8,128], index: 3, kind: output, shape index: {}]  }
   0x1   :  { %v71_v0 = vld [vmem:[%s1151_s1] sm:$0x7]  ;;  %v299_v2 = vsel %vm297_vm0, 4294967295, %v947_v1  ;;  %v908_v9 = vld [vmem:[%s1152_s0 + $0x8] sm:$0xff]  ;;  %v909_v13 = vld [vmem:[%s1152_s0 + $0x10] sm:$0xff]  ;;  %vm653_vm3 = vcmask 1041409  }
   0x2   :  { %v300_v3 = vsel %vm298_vm1, %v299_v2, 0  ;;  %v907_v5 = vld [vmem:[%s1152_s0] sm:$0xff]  ;;  %v916_v10 = vld [vmem:[%s1152_s0 + $0x48] sm:$0xff]  ;;  %v917_v14 = vld [vmem:[%s1152_s0 + $0x50] sm:$0xff]  ;;  %vm655_vm4 = vcmask 1042434   ;;  %vm657_vm5 = vcmask 1043459  }
   0x3   :  { %v302_v4 = vand.u32 %v300_v3, %v71_v0  ;;  %v915_v6 = vld [vmem:[%s1152_s0 + $0x40] sm:$0xff]  ;;  %v920_v11 = vld [vmem:[%s1152_s0 + $0x68] sm:$0xff]  ;;  %v921_v15 = vld [vmem:[%s1152_s0 + $0x70] sm:$0xff]  ;;  %vm659_vm6 = vcmask 1044484   ;;  %vm661_vm7 = vcmask 1045509   ;;  %vm663_vm8 = vcmask 1046534  }
   0x4   :  { %v919_v7 = vld [vmem:[%s1152_s0 + $0x60] sm:$0xff]  ;;  %v928_v12 = vld [vmem:[%s1152_s0 + $0xa8] sm:$0xff]  ;;  %v929_v16 = vld [vmem:[%s1152_s0 + $0xb0] sm:$0xff]  ;;  %vm665_vm9 = vcmask 1047559  }
   0x5   :  { %311 = vmatpush.bf16.msra.mxu0 %v302_v4  ;;  %943 = vmatpush.bf16.msra.mxu1 %v302_v4  ;;  %v927_v8 = vld [vmem:[%s1152_s0 + $0xa0] sm:$0xff]  ;;  %v910_v17 = vld [vmem:[%s1152_s0 + $0x18] sm:$0xff]  ;;  %v912_v24 = vld [vmem:[%s1152_s0 + $0x28] sm:$0xff] }
   0x6   :  { %944 = vmatpush.bf16.msra.mxu2 %v302_v4  ;;  %945 = vmatpush.bf16.msra.mxu3 %v302_v4  ;;  %v918_v18 = vld [vmem:[%s1152_s0 + $0x58] sm:$0xff]  ;;  %v911_v21 = vld [vmem:[%s1152_s0 + $0x20] sm:$0xff]  ;;  %v924_v25 = vld [vmem:[%s1152_s0 + $0x88] sm:$0xff] }
   0x7   :  { %v922_v19 = vld [vmem:[%s1152_s0 + $0x78] sm:$0xff]  ;;  %v923_v22 = vld [vmem:[%s1152_s0 + $0x80] sm:$0xff]  ;;  %v932_v26 = vld [vmem:[%s1152_s0 + $0xc8] sm:$0xff] }
   0x8   :  { %847 = vmatmul.msk.bf16.vlgmr.msra.gmra.mxu0 %vm212_vm2, %v907_v5  ;;  %855 = vmatmul.msk.bf16.vlgmr.msra.gmra.mxu1 %vm212_vm2, %v915_v6  ;;  %v930_v20 = vld [vmem:[%s1152_s0 + $0xb8] sm:$0xff]  ;;  %v931_v23 = vld [vmem:[%s1152_s0 + $0xc0] sm:$0xff]  ;;  %v913_v27 = vld [vmem:[%s1152_s0 + $0x30] sm:$0xff] }
   0x9   :  { %859 = vmatmul.msk.bf16.vlgmr.msra.gmra.mxu2 %vm212_vm2, %v919_v7  ;;  %867 = vmatmul.msk.bf16.vlgmr.msra.gmra.mxu3 %vm212_vm2, %v927_v8  ;;  %v925_v28 = vld [vmem:[%s1152_s0 + $0x90] sm:$0xff]  ;;  %v914_v30 = vld [vmem:[%s1152_s0 + $0x38] sm:$0xff] }
   0xa   :  { %v933_v29 = vld [vmem:[%s1152_s0 + $0xd0] sm:$0xff]  ;;  %v926_v31 = vld [vmem:[%s1152_s0 + $0x98] sm:$0xff] }
   0xb   :  { %v934_v32 = vld [vmem:[%s1152_s0 + $0xd8] sm:$0xff] }
  0x18   :  { %848 = vmatmul.msk.bf16.gmra.mxu0 %vm212_vm2, %v908_v9  ;;  %856 = vmatmul.msk.bf16.gmra.mxu1 %vm212_vm2, %v916_v10 }
  0x19   :  { %860 = vmatmul.msk.bf16.gmra.mxu2 %vm212_vm2, %v920_v11  ;;  %868 = vmatmul.msk.bf16.gmra.mxu3 %vm212_vm2, %v928_v12 }
  0x28   :  { %849 = vmatmul.msk.bf16.gmra.mxu0 %vm212_vm2, %v909_v13  ;;  %857 = vmatmul.msk.bf16.gmra.mxu1 %vm212_vm2, %v917_v14 }
  0x29   :  { %861 = vmatmul.msk.bf16.gmra.mxu2 %vm212_vm2, %v921_v15  ;;  %869 = vmatmul.msk.bf16.gmra.mxu3 %vm212_vm2, %v929_v16 }
  0x38   :  { %850 = vmatmul.msk.bf16.gmra.mxu0 %vm212_vm2, %v910_v17  ;;  %858 = vmatmul.msk.bf16.gmra.mxu1 %vm212_vm2, %v918_v18 }
  0x39   :  { %862 = vmatmul.msk.bf16.gmra.mxu2 %vm212_vm2, %v922_v19  ;;  %870 = vmatmul.msk.bf16.gmra.mxu3 %vm212_vm2, %v930_v20 }
  0x48   :  { %851 = vmatmul.msk.bf16.gmra.mxu0 %vm212_vm2, %v911_v21 }
  0x49   :  { %863 = vmatmul.msk.bf16.gmra.mxu2 %vm212_vm2, %v923_v22  ;;  %871 = vmatmul.msk.bf16.gmra.mxu3 %vm212_vm2, %v931_v23 }
  0x58   :  { %852 = vmatmul.msk.bf16.gmra.mxu0 %vm212_vm2, %v912_v24 }
  0x59   :  { %864 = vmatmul.msk.bf16.gmra.mxu2 %vm212_vm2, %v924_v25  ;;  %872 = vmatmul.msk.bf16.gmra.mxu3 %vm212_vm2, %v932_v26 }
  0x68   :  { %853 = vmatmul.msk.bf16.gmra.mxu0 %vm212_vm2, %v913_v27 }
  0x69   :  { %865 = vmatmul.msk.bf16.gmra.mxu2 %vm212_vm2, %v925_v28  ;;  %873 = vmatmul.msk.bf16.gmra.mxu3 %vm212_vm2, %v933_v29 }
  0x78   :  { %854 = vmatmul.msk.bf16.gmra.mxu0 %vm212_vm2, %v914_v30 }
  0x79   :  { %866 = vmatmul.msk.bf16.gmra.mxu2 %vm212_vm2, %v926_v31  ;;  %874 = vmatmul.msk.bf16.gmra.mxu3 %vm212_vm2, %v934_v32 }
  0x85   :  { %v313_v33 = vpop.f32.mrf.mxu0  ;;  %v1083_v34 = vpop.f32.mrf.mxu1 }
  0x86   :  { %v453_v39 = vmax.f32 %v313_v33, 0.0 }
  0x8c   :  { %v1085_v35 = vpop.f32.mrf.mxu2  ;;  %v1087_v36 = vpop.f32.mrf.mxu3 }
  0x8d   :  { %v315_v37 = vpop.f32.mrf.mxu0  ;;  %v1089_v38 = vpop.f32.mrf.mxu1  ;;  %v477_v30 = vmax.f32 %v1085_v35, 0.0 }
  0x8e   :  { %v454_v40 = vmax.f32 %v315_v37, 0.0 }
  0x90   :  { %v509_v41 = vadd.f32 %v454_v40, %v453_v39 }
  0x94   :  { %v375_v42 = vpop.f32.mrf.mxu2  ;;  %v1091_v43 = vpop.f32.mrf.mxu3 }
  0x95   :  { %v318_v44 = vpop.f32.mrf.mxu0  ;;  %v1093_v45 = vpop.f32.mrf.mxu1  ;;  %v478_v32 = vmax.f32 %v375_v42, 0.0 }
  0x96   :  { %v455_v46 = vmax.f32 %v318_v44, 0.0 }
  0x98   :  { %v510_v47 = vadd.f32 %v509_v41, %v455_v46 }
  0x9c   :  { %v378_v48 = vpop.f32.mrf.mxu2  ;;  %v418_v49 = vpop.f32.mrf.mxu3 }
  0x9d   :  { %v320_v50 = vpop.f32.mrf.mxu0  ;;  %v1095_v51 = vpop.f32.mrf.mxu1  ;;  %v495_v54 = vmax.f32 %v418_v49, 0.0  ;;  %v479_v37 = vmax.f32 %v378_v48, 0.0 }
  0x9e   :  { %v456_v52 = vmax.f32 %v320_v50, 0.0 }
  0xa0   :  { %v511_v53 = vadd.f32 %v510_v47, %v456_v52 }
  0xa4   :  { %v380_v55 = vpop.f32.mrf.mxu2  ;;  %v420_v56 = vpop.f32.mrf.mxu3 }
  0xa5   :  { %v496_v57 = vmax.f32 %v420_v56, 0.0  ;;  %v323_v58 = vpop.f32.mrf.mxu0  ;;  %v1097_v59 = vpop.f32.mrf.mxu1  ;;  %v480_v46 = vmax.f32 %v380_v55, 0.0 }
  0xa6   :  { %v457_v60 = vmax.f32 %v323_v58, 0.0 }
  0xa7   :  { %v581_v61 = vadd.f32 %v496_v57, %v495_v54  ;;  %v942_v54 = vld [vmem:[%s1153_s2 + $0x38] sm:$0xff] }
  0xa8   :  { %v512_v62 = vadd.f32 %v511_v53, %v457_v60  ;;  %717 = vmatpush.bf16.msrb.mxu1 %v942_v54 }
  0xac   :  { %v383_v63 = vpop.f32.mrf.mxu2  ;;  %v423_v0 = vpop.f32.mrf.mxu3 }
  0xad   :  { %v497_v1 = vmax.f32 %v423_v0, 0.0  ;;  %v325_v2 = vpop.f32.mrf.mxu0  ;;  %v365_v3 = vpop.f32.mrf.mxu1  ;;  %v481_v9 = vmax.f32 %v383_v63, 0.0  ;;  %v940_v0 = vld [vmem:[%s1153_s2 + $0x28] sm:$0xff] }
  0xae   :  { %v458_v4 = vmax.f32 %v325_v2, 0.0  ;;  %v474_v17 = vmax.f32 %v365_v3, 0.0 }
  0xaf   :  { %v582_v5 = vadd.f32 %v581_v61, %v497_v1  ;;  %v941_v61 = vld [vmem:[%s1153_s2 + $0x30] sm:$0xff] }
  0xb0   :  { %v513_v6 = vadd.f32 %v512_v62, %v458_v4  ;;  %718 = vmatpush.bf16.msrb.mxu1 %v941_v61 }
  0xb4   :  { %v385_v7 = vpop.f32.mrf.mxu2  ;;  %v425_v8 = vpop.f32.mrf.mxu3  ;;  %719 = vmatpush.bf16.msrb.mxu1 %v940_v0 }
  0xb5   :  { %v482_v10 = vmax.f32 %v385_v7, 0.0  ;;  %v498_v11 = vmax.f32 %v425_v8, 0.0  ;;  %v328_v12 = vpop.f32.mrf.mxu0  ;;  %v368_v13 = vpop.f32.mrf.mxu1 }
  0xb6   :  { %v459_v14 = vmax.f32 %v328_v12, 0.0  ;;  %v475_v19 = vmax.f32 %v368_v13, 0.0 }
  0xb7   :  { %v557_v15 = vadd.f32 %v482_v10, %v481_v9  ;;  %v583_v16 = vadd.f32 %v582_v5, %v498_v11 }
  0xb8   :  { %v1099_v18 = vadd.f32 %v513_v6, %v459_v14  ;;  %v545_v20 = vadd.f32 %v475_v19, %v474_v17  ;;  %v939_v17 = vld [vmem:[%s1153_s2 + $0x20] sm:$0xff] }
  0xb9   :  { %720 = vmatpush.bf16.msrb.mxu1 %v939_v17 }
  0xbc   :  { %v388_v21 = vpop.f32.mrf.mxu2  ;;  %v428_v22 = vpop.f32.mrf.mxu3 }
  0xbd   :  { %v483_v23 = vmax.f32 %v388_v21, 0.0  ;;  %v499_v24 = vmax.f32 %v428_v22, 0.0  ;;  %v330_v25 = vpop.f32.mrf.mxu0  ;;  %v370_v26 = vpop.f32.mrf.mxu1 }
  0xbe   :  { %v476_v27 = vmax.f32 %v370_v26, 0.0  ;;  %v460_v1 = vmax.f32 %v330_v25, 0.0 }
  0xbf   :  { %v558_v28 = vadd.f32 %v557_v15, %v483_v23  ;;  %v1101_v29 = vadd.f32 %v583_v16, %v499_v24 }
  0xc0   :  { %v546_v31 = vadd.f32 %v545_v20, %v476_v27 }
  0xc2   :  { %v547_v33 = vadd.f32 %v546_v31, %v477_v30  ;;  %v938_v30 = vld [vmem:[%s1153_s2 + $0x18] sm:$0xff] }
  0xc3   :  { %721 = vmatpush.bf16.msrb.mxu1 %v938_v30 }
  0xc4   :  { %v548_v39 = vadd.f32 %v547_v33, %v478_v32  ;;  %v390_v40 = vpop.f32.mrf.mxu2  ;;  %v430_v41 = vpop.f32.mrf.mxu3 }
  0xc5   :  { %v333_v44 = vpop.f32.mrf.mxu0  ;;  %v484_v12 = vmax.f32 %v390_v40, 0.0  ;;  %v500_v25 = vmax.f32 %v430_v41, 0.0  ;;  %v937_v41 = vld [vmem:[%s1153_s2 + $0x10] sm:$0xff] }
  0xc6   :  { %v549_v47 = vadd.f32 %v548_v39, %v479_v37  ;;  %v461_v63 = vmax.f32 %v333_v44, 0.0 }
  0xc7   :  { %v559_v19 = vadd.f32 %v558_v28, %v484_v12  ;;  %v515_v28 = vrot.slane %v1099_v18, 4  ;;  %v585_v39 = vadd.f32 %v1101_v29, %v500_v25  ;;  %722 = vmatpush.bf16.msrb.mxu1 %v937_v41  ;;  %v469_v29 = vmax.f32 %v1083_v34, 0.0  ;;  %v935_v34 = vld [vmem:[%s1153_s2] sm:$0xff] }
  0xc8   :  { %v1104_v49 = vadd.f32 %v549_v47, %v480_v46  ;;  %v521_v3 = vadd.f32 %v461_v63, %v460_v1  ;;  %v471_v12 = vmax.f32 %v1093_v45, 0.0  ;;  %v493_v45 = vmax.f32 %v1087_v36, 0.0 }
  0xca   :  { %v551_v47 = vrot.slane %v1104_v49, 4 }
  0xcc   :  { %v393_v50 = vpop.f32.mrf.mxu2  ;;  %v433_v52 = vpop.f32.mrf.mxu3 }
  0xcd   :  { %v335_v53 = vpop.f32.mrf.mxu0  ;;  %v485_v15 = vmax.f32 %v393_v50, 0.0  ;;  %v501_v31 = vmax.f32 %v433_v52, 0.0 }
  0xce   :  { %v462_v2 = vmax.f32 %v335_v53, 0.0 }
  0xcf   :  { %v560_v26 = vadd.f32 %v559_v19, %v485_v15  ;;  %v586_v50 = vadd.f32 %v585_v39, %v501_v31 }
  0xd0   :  { %v522_v5 = vadd.f32 %v521_v3, %v462_v2  ;;  %v552_v3 = vadd.f32 %v551_v47, %v1104_v49 }
  0xd2   :  { %v553_v15 = vrot.slane %v552_v3, 2 }
  0xd4   :  { %v395_v35 = vpop.f32.mrf.mxu2  ;;  %v435_v42 = vpop.f32.mrf.mxu3 }
  0xd5   :  { %v338_v56 = vpop.f32.mrf.mxu0  ;;  %v486_v20 = vmax.f32 %v395_v35, 0.0  ;;  %v502_v44 = vmax.f32 %v435_v42, 0.0  ;;  %v936_v35 = vld [vmem:[%s1153_s2 + $0x8] sm:$0xff]  ;;  %v516_v42 = vadd.f32 %v515_v28, %v1099_v18 }
  0xd6   :  { %v463_v4 = vmax.f32 %v338_v56, 0.0  ;;  %723 = vmatpush.bf16.msrb.mxu1 %v936_v35 }
  0xd7   :  { %v561_v32 = vadd.f32 %v560_v26, %v486_v20 }
  0xd8   :  { %v523_v10 = vadd.f32 %v522_v5, %v463_v4  ;;  %v587_v4 = vrot.slane %v586_v50, 4 }
  0xda   :  { %724 = vmatpush.bf16.msrb.mxu1 %v935_v34 }
  0xdc   :  { %v398_v48 = vpop.f32.mrf.mxu2  ;;  %v438_v57 = vpop.f32.mrf.mxu3 }
  0xdd   :  { %v340_v58 = vpop.f32.mrf.mxu0  ;;  %v487_v27 = vmax.f32 %v398_v48, 0.0  ;;  %v503_v37 = vmax.f32 %v438_v57, 0.0 }
  0xde   :  { %v464_v6 = vmax.f32 %v340_v58, 0.0 }
  0xdf   :  { %v562_v40 = vadd.f32 %v561_v32, %v487_v27  ;;  %v593_v56 = vadd.f32 %v503_v37, %v502_v44  ;;  %v473_v37 = vmax.f32 %v1097_v59, 0.0 }
  0xe0   :  { %v524_v13 = vadd.f32 %v523_v10, %v464_v6  ;;  %v470_v10 = vmax.f32 %v1089_v38, 0.0  ;;  %v472_v38 = vmax.f32 %v1095_v51, 0.0 }
  0xe4   :  { %v1109_v60 = vpop.f32.mrf.mxu2  ;;  %v1111_v55 = vpop.f32.mrf.mxu3 }
  0xe5   :  { %v343_v62 = vpop.f32.mrf.mxu0  ;;  %v504_v46 = vmax.f32 %v1111_v55, 0.0  ;;  %v563_v55 = vrot.slane %v562_v40, 4  ;;  %v488_v63 = vmax.f32 %v1109_v60, 0.0 }
  0xe6   :  { %v465_v11 = vmax.f32 %v343_v62, 0.0 }
  0xe7   :  { %v594_v0 = vadd.f32 %v593_v56, %v504_v46  ;;  %v564_v60 = vadd.f32 %v563_v55, %v562_v40  ;;  %v554_v40 = vadd.f32 %v553_v15, %v552_v3 }
  0xe8   :  { %v525_v16 = vadd.f32 %v524_v13, %v465_v11  ;;  %v517_v13 = vrot.slane %v516_v42, 2 }
  0xe9   :  { %v565_v26 = vrot.slane %v564_v60, 2  ;;  %v555_v35 = vrot.slane %v554_v40, 1 }
  0xea   :  { %v518_v30 = vadd.f32 %v517_v13, %v516_v42 }
  0xeb   :  { %v566_v47 = vadd.f32 %v565_v26, %v564_v60 }
  0xec   :  { %v403_v7 = vpop.f32.mrf.mxu2  ;;  %v443_v8 = vpop.f32.mrf.mxu3  ;;  %v519_v51 = vrot.slane %v518_v30, 1 }
  0xed   :  { %v345_v9 = vpop.f32.mrf.mxu0  ;;  %v489_v48 = vmax.f32 %v403_v7, 0.0  ;;  %v505_v57 = vmax.f32 %v443_v8, 0.0 }
  0xee   :  { %v466_v14 = vmax.f32 %v345_v9, 0.0  ;;  %v520_v59 = vadd.f32 %v519_v51, %v518_v30 }
  0xef   :  { %v569_v7 = vadd.f32 %v489_v48, %v488_v63  ;;  %v595_v18 = vadd.f32 %v594_v0, %v505_v57 }
  0xf0   :  { %v526_v21 = vadd.f32 %v525_v16, %v466_v14  ;;  %v588_v16 = vadd.f32 %v587_v4, %v586_v50  ;;  %v605_v4 = vmul.f32 0.020408163, %v520_v59 }
  0xf2   :  { %v527_v33 = vrot.slane %v526_v21, 4  ;;  %v589_v28 = vrot.slane %v588_v16, 2 }
  0xf4   :  { %v405_v22 = vpop.f32.mrf.mxu2  ;;  %v445_v23 = vpop.f32.mrf.mxu3  ;;  %v528_v52 = vadd.f32 %v527_v33, %v526_v21  ;;  %v494_v33 = vmax.f32 %v1091_v43, 0.0  ;;  %v567_v43 = vrot.slane %v566_v47, 1 }
  0xf5   :  { %v348_v24 = vpop.f32.mrf.mxu0  ;;  %v490_v1 = vmax.f32 %v405_v22, 0.0  ;;  %v506_v2 = vmax.f32 %v445_v23, 0.0 }
  0xf6   :  { %v467_v61 = vmax.f32 %v348_v24, 0.0  ;;  %v529_v5 = vrot.slane %v528_v52, 2 }
  0xf7   :  { %v570_v49 = vadd.f32 %v569_v7, %v490_v1  ;;  %v596_v14 = vadd.f32 %v595_v18, %v506_v2  ;;  %v568_v2 = vadd.f32 %v567_v43, %v566_v47 }
  0xf8   :  { %v530_v17 = vadd.f32 %v529_v5, %v528_v52 }
  0xfa   :  { %v531_v41 = vrot.slane %v530_v17, 1 }
  0xfc   :  { %v408_v53 = vpop.f32.mrf.mxu2  ;;  %v448_v54 = vpop.f32.mrf.mxu3 }
  0xfd   :  { %v350_v58 = vpop.f32.mrf.mxu0  ;;  %v491_v8 = vmax.f32 %v408_v53, 0.0  ;;  %v507_v9 = vmax.f32 %v448_v54, 0.0  ;;  %v590_v54 = vadd.f32 %v589_v28, %v588_v16 }
  0xfe   :  { %v468_v62 = vmax.f32 %v350_v58, 0.0 }
  0xff   :  { %v571_v22 = vadd.f32 %v570_v49, %v491_v8  ;;  %v597_v23 = vadd.f32 %v596_v14, %v507_v9  ;;  %v591_v55 = vrot.slane %v590_v54, 1 }
 0x100   :  { %v533_v6 = vadd.f32 %v468_v62, %v467_v61  ;;  %v556_v62 = vadd.f32 %v555_v35, %v554_v40 }
 0x102   :  { %v534_v11 = vadd.f32 %v533_v6, %v469_v29  ;;  %v532_v29 = vadd.f32 %v531_v41, %v530_v17  ;;  %v592_v6 = vadd.f32 %v591_v55, %v590_v54  ;;  %v608_v7 = vmul.f32 0.020408163, %v556_v62 }
 0x104   :  { %v535_v19 = vadd.f32 %v534_v11, %v470_v10  ;;  %v410_v20 = vpop.f32.mrf.mxu2  ;;  %v450_v21 = vpop.f32.mrf.mxu3  ;;  %v606_v63 = vmul.f32 0.020408163, %v532_v29  ;;  %v609_v10 = vmul.f32 0.020408163, %v568_v2  ;;  %v613_v11 = vpack.c.bf16 %v605_v4, %v605_v4 }
 0x105   :  { %v492_v24 = vmax.f32 %v410_v20, 0.0  ;;  %v508_v25 = vmax.f32 %v450_v21, 0.0  ;;  %v611_v13 = vmul.f32 0.020408163, %v592_v6  ;;  %v616_v14 = vpack.c.bf16 %v608_v7, %v608_v7 }
 0x106   :  { %v536_v27 = vadd.f32 %v535_v19, %v471_v12  ;;  %v614_v18 = vpack.c.bf16 %v606_v63, %v606_v63  ;;  %v617_v19 = vpack.c.bf16 %v609_v10, %v609_v10  ;;  %v645_v21 = vunpack.c.l.b16 %v613_v11 }
 0x107   :  { %v572_v31 = vadd.f32 %v571_v22, %v492_v24  ;;  %v598_v32 = vadd.f32 %v597_v23, %v508_v25  ;;  %v619_v23 = vpack.c.bf16 %v611_v13, %v611_v13  ;;  %v648_v26 = vunpack.c.l.b16 %v616_v14 }
 0x108   :  { %v537_v39 = vadd.f32 %v536_v27, %v472_v38  ;;  %v646_v15 = vunpack.c.l.b16 %v614_v18  ;;  %v649_v27 = vunpack.c.l.b16 %v617_v19 }
 0x109   :  { %v573_v44 = vadd.f32 %v572_v31, %v493_v45  ;;  %v599_v46 = vrot.slane %v598_v32, 4 }
 0x10a   :  { %v538_v50 = vadd.f32 %v537_v39, %v473_v37  ;;  %v654_v25 = vsel %vm653_vm3, %v646_v15, %v645_v21 }
 0x10b   :  { %v574_v52 = vadd.f32 %v573_v44, %v494_v33  ;;  %v600_v53 = vadd.f32 %v599_v46, %v598_v32  ;;  %v651_v32 = vunpack.c.l.b16 %v619_v23 }
 0x10c   :  { %v539_v36 = vrot.slane %v538_v50, 4 }
 0x10d   :  { %v575_v56 = vrot.slane %v574_v52, 4  ;;  %v601_v48 = vrot.slane %v600_v53, 2 }
 0x10e   :  { %v540_v57 = vadd.f32 %v539_v36, %v538_v50 }
 0x10f   :  { %v576_v58 = vadd.f32 %v575_v56, %v574_v52  ;;  %v602_v42 = vadd.f32 %v601_v48, %v600_v53 }
 0x110   :  { %v541_v61 = vrot.slane %v540_v57, 2 }
 0x111   :  { %v577_v0 = vrot.slane %v576_v58, 2  ;;  %v603_v1 = vrot.slane %v602_v42, 1 }
 0x112   :  { %v542_v3 = vadd.f32 %v541_v61, %v540_v57 }
 0x113   :  { %v578_v5 = vadd.f32 %v577_v0, %v576_v58  ;;  %v604_v9 = vadd.f32 %v603_v1, %v602_v42 }
 0x114   :  { %v543_v34 = vrot.slane %v542_v3, 1 }
 0x115   :  { %v579_v8 = vrot.slane %v578_v5, 1  ;;  %v612_v17 = vmul.f32 0.020408163, %v604_v9 }
 0x116   :  { %v544_v60 = vadd.f32 %v543_v34, %v542_v3 }
 0x117   :  { %v580_v12 = vadd.f32 %v579_v8, %v578_v5  ;;  %v620_v38 = vpack.c.bf16 %v612_v17, %v612_v17 }
 0x118   :  { %v607_v49 = vmul.f32 0.020408163, %v544_v60 }
 0x119   :  { %v610_v16 = vmul.f32 0.020408163, %v580_v12  ;;  %v652_v37 = vunpack.c.l.b16 %v620_v38 }
 0x11a   :  { %v615_v20 = vpack.c.bf16 %v607_v49, %v607_v49 }
 0x11b   :  { %v618_v22 = vpack.c.bf16 %v610_v16, %v610_v16 }
 0x11c   :  { %v647_v24 = vunpack.c.l.b16 %v615_v20 }
 0x11d   :  { %v650_v30 = vunpack.c.l.b16 %v618_v22 }
 0x11e   :  { %v656_v45 = vsel %vm655_vm4, %v647_v24, %v654_v25 }
 0x11f   :  { %v658_v31 = vsel %vm657_vm5, %v648_v26, %v656_v45 }
 0x120   :  { %v660_v33 = vsel %vm659_vm6, %v649_v27, %v658_v31 }
 0x121   :  { %v662_v28 = vsel %vm661_vm7, %v650_v30, %v660_v33 }
 0x122   :  { %v664_v39 = vsel %vm663_vm8, %v651_v32, %v662_v28 }
 0x123   :  { %v666_v40 = vsel %vm665_vm9, %v652_v37, %v664_v39 }
 0x124   :  { %v667_v41 = vpack.c.b16 %v666_v40, %v666_v40 }
 0x126   :  { %725 = vmatmul.bf16.vlgmr.msrb.gmra.mxu1 %v667_v41 }
 0x1a3   :  { %v726_v44 = vpop.f32.mrf.mxu1 }
 0x1a4   :  { %730 = vst [vmem:[%s1154_s3] sm:$0xff] %v726_v44 }
 0x1ab   :  { %v728_v46 = vpop.f32.mrf.mxu1 }

</bundles_post_ra>
